<compile_context>
chip_gen: v5e
topology: v5e:2x2
jax: 0.10.0
libtpu: 0.0.40
codegen_flags: <defaults>
</compile_context>

<pallas_src>
import jax
import jax.numpy as jnp
from jax import lax
from jax.experimental import pallas as pl
from jax.experimental.pallas import tpu as pltpu

LANES = 128                 # lane width of a vreg
SUBLANES = 8                # f32 sublanes of a vreg
ACC_CHAINS = 4              # independent accumulation chains -> (32, 128) acc
NUM_SLICES = 2              # leading "parallel" grid axis (v7x: 1 per TC)
BLOCK_BYTES = 8 << 20       # ~8 MiB of input HBM per grid step


def _round_up(x, m):
    return ((x + m - 1) // m) * m


def _make_kernel(sat, rows_valid, row_tile, blocks_per_slice, acc_rows):
    """sat / rows_valid / row_tile / blocks_per_slice / acc_rows are static."""

    def kernel(x_ref, o_ref, acc_ref):
        i = pl.program_id(0)                 # slice (parallel axis)
        j = pl.program_id(1)                 # block within slice (arbitrary)

        @pl.when(j == 0)
        def _():
            acc_ref[...] = jnp.zeros_like(acc_ref)

        # Unclamped linear block index -> first global row of this block.
        row_start = (i * blocks_per_slice + j) * row_tile
        valid_rows = rows_valid - row_start  # may be <= 0 or >= row_tile

        # Skip all VPU work for wholly-invalid (clamped duplicate) blocks.
        @pl.when(valid_rows > 0)
        def _():
            # Keep the f32 cast so bf16 inputs reduce exactly like the
            # reference (bf16 -> f32, then penalty / square / accumulate).
            x = x_ref[...].astype(jnp.float32)
            if sat >= 0.0:
                # relu(-x) + relu(x - sat) == x - clip(x, 0, sat) for sat >= 0
                # (the two relu terms are mutually exclusive).
                pen = x - jnp.clip(x, 0.0, sat)
            else:
                pen = jnp.maximum(-x, 0.0) + jnp.maximum(x - sat, 0.0)
            pen2 = pen * pen

            def _partial(v):
                # (row_tile, 128) -> (row_tile/acc_rows, acc_rows, 128) groups
                # whole (8, 128) tiles (no relayout); summing the leading axis
                # is pure VPU adds over `acc_rows/8` independent chains.
                return jnp.sum(
                    v.reshape(row_tile // acc_rows, acc_rows, LANES), axis=0)

            # Fast path: block fully inside the valid rows -> no masking.
            @pl.when(valid_rows >= row_tile)
            def _():
                acc_ref[...] += _partial(pen2)

            # Slow path (at most once per slice): select away rows past the
            # valid range so Pallas-padded garbage contributes exactly 0.
            @pl.when(valid_rows < row_tile)
            def _():
                row_ids = lax.broadcasted_iota(
                    jnp.int32, (row_tile, LANES), 0)
                acc_ref[...] += _partial(
                    jnp.where(row_ids < valid_rows, pen2, 0.0))

        @pl.when(j == pl.num_programs(1) - 1)
        def _():
            o_ref[0, 0] = jnp.sum(acc_ref[...])

    return kernel


def rgb_saturation_loss(rgb: jax.Array, saturation_val: float,
                        *, block_bytes: int = BLOCK_BYTES) -> jax.Array:
    """Scalar float32 loss matching the PyTorch module."""
    sat = float(saturation_val)
    n = rgb.size
    itemsize = jnp.dtype(rgb.dtype).itemsize

    flat = jnp.ravel(rgb)                    # free for contiguous layouts

    def _penalty_sq(v):
        x = v.astype(jnp.float32)
        pen = jnp.maximum(-x, 0.0) + jnp.maximum(x - sat, 0.0)
        return pen * pen

    # Unaligned tail (< 128 elements) is reduced with plain jnp instead of
    # paying a full-array pad copy for this HBM-bound kernel.
    tail = n % LANES
    aligned = n - tail
    rows = aligned // LANES
    tail_sum = jnp.float32(0.0)
    if tail:
        tail_sum = jnp.sum(_penalty_sq(flat[aligned:]))

    if rows == 0:
        # Entire tensor is smaller than one lane row: pure-jnp fallback.
        return tail_sum / jnp.float32(n)

    x2d = (flat[:aligned] if tail else flat).reshape(rows, LANES)

    # dtype-scaled tile: ~block_bytes of input HBM per grid step, clamped for
    # small inputs (always a multiple of 8 sublanes).
    max_rows = max(SUBLANES,
                   (block_bytes // (LANES * itemsize)) // SUBLANES * SUBLANES)
    row_tile = min(max_rows, _round_up(rows, SUBLANES))

    # Widest accumulator whose row count divides the tile (up to 4 chains).
    chains = 1
    for c in (ACC_CHAINS, 2):
        if row_tile % (c * SUBLANES) == 0:
            chains = c
            break
    acc_rows = chains * SUBLANES

    num_blocks = pl.cdiv(rows, row_tile)
    num_slices = NUM_SLICES if num_blocks >= NUM_SLICES else 1
    blocks_per_slice = pl.cdiv(num_blocks, num_slices)
    grid = (num_slices, blocks_per_slice)

    def in_index_map(i, j):
        # Clamp so every grid point maps to an in-range block; overhanging
        # duplicates are detected (valid_rows <= 0) and skipped in-kernel.
        return (jnp.minimum(i * blocks_per_slice + j, num_blocks - 1), 0)

    # Double-buffered input + accumulator + headroom.  Raises v5e's 16 MiB
    # default scoped limit when needed; stays well under v7x's 64 MiB VMEM.
    block_b = row_tile * LANES * itemsize
    vmem_limit = int(max(16 << 20, 2 * block_b + (8 << 20)))

    partials = pl.pallas_call(
        _make_kernel(sat, rows, row_tile, blocks_per_slice, acc_rows),
        out_shape=jax.ShapeDtypeStruct((num_slices, 1), jnp.float32),
        grid_spec=pltpu.PrefetchScalarGridSpec(
            num_scalar_prefetch=0,
            grid=grid,
            in_specs=[pl.BlockSpec((row_tile, LANES), in_index_map)],
            out_specs=pl.BlockSpec(
                (1, 1), lambda i, j: (i, 0), memory_space=pltpu.SMEM),
            scratch_shapes=[pltpu.VMEM((acc_rows, LANES), jnp.float32)],
        ),
        compiler_params=pltpu.CompilerParams(
            dimension_semantics=("parallel", "arbitrary"),
            vmem_limit_bytes=vmem_limit),
        cost_estimate=pl.CostEstimate(
            flops=5 * aligned, transcendentals=0,
            bytes_accessed=aligned * itemsize + num_slices * 4),
    )(x2d)

    loss = (jnp.sum(partials) + tail_sum) / jnp.float32(n)
    # TODO(synk): the PyTorch module prints 'NaN saturation loss!' on NaN;
    # side-effectful printing is omitted (value semantics are unchanged).
    return loss


def _reference(rgb, saturation_val):
    x = rgb.astype(jnp.float32)
    pen = jnp.maximum(-x, 0.0) + jnp.maximum(x - saturation_val, 0.0)
    return jnp.mean(pen * pen)


if __name__ == "__main__":
    key = jax.random.PRNGKey(0)
    # Small NCHW image batch; values spill outside [0, 1] so both relus fire.
    rgb = jax.random.uniform(
        key, (2, 4, 16, 16), dtype=jnp.float32, minval=-0.5, maxval=1.5)
    sat = 1.0

    loss = jax.block_until_ready(rgb_saturation_loss(rgb, sat))
    ref = _reference(rgb, sat)
    assert jnp.allclose(loss, ref, rtol=1e-5, atol=1e-6), (loss, ref)

    # bf16 input: native dtype goes straight into the kernel (half the HBM
    # bytes), cast to f32 on the VPU inside -- matches the reference exactly.
    rgb_bf16 = rgb.astype(jnp.bfloat16)
    loss_bf = jax.block_until_ready(rgb_saturation_loss(rgb_bf16, sat))
    ref_bf = _reference(rgb_bf16, sat)
    assert jnp.allclose(loss_bf, ref_bf, rtol=1e-4, atol=1e-6), (loss_bf, ref_bf)

    # Element count not divisible by 128 (jnp tail path, no pad copy) and a
    # negative saturation value (two-relu penalty branch).
    rgb_odd = jax.random.normal(jax.random.PRNGKey(1), (3, 3, 5, 7),
                                dtype=jnp.float32)
    loss_odd = jax.block_until_ready(rgb_saturation_loss(rgb_odd, -0.25))
    ref_odd = _reference(rgb_odd, -0.25)
    assert jnp.allclose(loss_odd, ref_odd, rtol=1e-5, atol=1e-6), (loss_odd, ref_odd)

    # Multi-block / 2-slice path with a small forced block size: exercises the
    # fast interior path, the masked partial block, and a clamped duplicate
    # block that is skipped (valid_rows <= 0), while keeping the test tiny.
    rgb_multi = jax.random.uniform(jax.random.PRNGKey(2), (2, 4, 40, 128),
                                   dtype=jnp.float32, minval=-0.5, maxval=1.5)
    loss_multi = jax.block_until_ready(
        rgb_saturation_loss(rgb_multi, sat, block_bytes=64 << 10))
    ref_multi = _reference(rgb_multi, sat)
    assert jnp.allclose(loss_multi, ref_multi, rtol=1e-5, atol=1e-6), (
        loss_multi, ref_multi)

    print("KERNEL_OK")
</pallas_src>

<mosaic_0001>
module attributes {stable_mosaic.version = 11 : i64} {
  func.func @kernel(%arg0: i32, %arg1: i32, %arg2: memref<16x128xf32, #tpu.memory_space<vmem>>, %arg3: memref<1x1xf32, #tpu.memory_space<smem>>, %arg4: memref<16x128xf32, #tpu.memory_space<vmem>>) attributes {dimension_semantics = [#tpu.dimension_semantics<parallel>, #tpu.dimension_semantics<arbitrary>], iteration_bounds = array<i64: 1, 1>, scalar_prefetch = 0 : i64, scratch_operands = 1 : i64, tpu.core_type = #tpu.core_type<tc>, window_params = [{transform_indices = @transform_0, window_bounds = array<i64: 16, 128>}, {transform_indices = @transform_1, window_bounds = array<i64: 1, 1>}]} {
    %c0_i32 = arith.constant 0 : i32
    %0 = arith.cmpi eq, %arg1, %c0_i32 : i32
    %1 = arith.extui %0 : i1 to i32
    %c0_i32_0 = arith.constant 0 : i32
    %2 = arith.cmpi ne, %1, %c0_i32_0 : i32
    scf.if %2 {
      %cst = arith.constant 0.000000e+00 : f32
      %13 = vector.broadcast %cst : f32 to vector<16x128xf32>
      %c0 = arith.constant 0 : index
      %c0_6 = arith.constant 0 : index
      %14 = vector.load %arg4[%c0, %c0_6] : memref<16x128xf32, #tpu.memory_space<vmem>>, vector<16x128xf32>
      tpu.vector_store %arg4[%c0, %c0_6], %13 {strides = array<i32>} : memref<16x128xf32, #tpu.memory_space<vmem>>, vector<16x128xf32>,
    } else {
    }
    %c1_i32 = arith.constant 1 : i32
    %3 = arith.muli %arg0, %c1_i32 : i32
    %4 = arith.addi %3, %arg1 : i32
    %c16_i32 = arith.constant 16 : i32
    %5 = arith.muli %4, %c16_i32 : i32
    %c16_i32_1 = arith.constant 16 : i32
    %6 = arith.subi %c16_i32_1, %5 : i32
    %c0_i32_2 = arith.constant 0 : i32
    %7 = arith.cmpi sgt, %6, %c0_i32_2 : i32
    %8 = arith.extui %7 : i1 to i32
    %c0_i32_3 = arith.constant 0 : i32
    %9 = arith.cmpi ne, %8, %c0_i32_3 : i32
    scf.if %9 {
      %c0 = arith.constant 0 : index
      %c0_6 = arith.constant 0 : index
      %13 = vector.load %arg2[%c0, %c0_6] : memref<16x128xf32, #tpu.memory_space<vmem>>, vector<16x128xf32>
      %cst = arith.constant 0.000000e+00 : f32
      %cst_7 = arith.constant 1.000000e+00 : f32
      %14 = vector.broadcast %cst : f32 to vector<16x128xf32>
      %15 = arith.maximumf %14, %13 : vector<16x128xf32>
      %16 = vector.broadcast %cst_7 : f32 to vector<16x128xf32>
      %17 = arith.minimumf %16, %15 : vector<16x128xf32>
      %18 = arith.subf %13, %17 : vector<16x128xf32>
      %19 = arith.mulf %18, %18 : vector<16x128xf32>
      %c16_i32_8 = arith.constant 16 : i32
      %20 = arith.cmpi sge, %6, %c16_i32_8 : i32
      %21 = arith.extui %20 : i1 to i32
      %c0_i32_9 = arith.constant 0 : i32
      %22 = arith.cmpi ne, %21, %c0_i32_9 : i32
      scf.if %22 {
        %c0_12 = arith.constant 0 : index
        %c0_13 = arith.constant 0 : index
        %26 = vector.load %arg4[%c0_12, %c0_13] : memref<16x128xf32, #tpu.memory_space<vmem>>, vector<16x128xf32>
        %27 = vector.shape_cast %19 : vector<16x128xf32> to vector<1x16x128xf32>
        %cst_14 = arith.constant dense<0.000000e+00> : vector<16x128xf32>
        %28 = vector.multi_reduction <add>, %27, %cst_14 [0] : vector<1x16x128xf32> to vector<16x128xf32>
        %29 = arith.addf %26, %28 : vector<16x128xf32>
        %c0_15 = arith.constant 0 : index
        %c0_16 = arith.constant 0 : index
        %30 = vector.load %arg4[%c0_15, %c0_16] : memref<16x128xf32, #tpu.memory_space<vmem>>, vector<16x128xf32>
        tpu.vector_store %arg4[%c0_15, %c0_16], %29 {strides = array<i32>} : memref<16x128xf32, #tpu.memory_space<vmem>>, vector<16x128xf32>,
      } else {
      }
      %c16_i32_10 = arith.constant 16 : i32
      %23 = arith.cmpi slt, %6, %c16_i32_10 : i32
      %24 = arith.extui %23 : i1 to i32
      %c0_i32_11 = arith.constant 0 : i32
      %25 = arith.cmpi ne, %24, %c0_i32_11 : i32
      scf.if %25 {
        %26 = tpu.iota {dimensions = array<i32: 0>} : vector<16x128xi32>
        %c0_12 = arith.constant 0 : index
        %c0_13 = arith.constant 0 : index
        %27 = vector.load %arg4[%c0_12, %c0_13] : memref<16x128xf32, #tpu.memory_space<vmem>>, vector<16x128xf32>
        %28 = vector.broadcast %6 : i32 to vector<16x128xi32>
        %29 = arith.cmpi slt, %26, %28 : vector<16x128xi32>
        %cst_14 = arith.constant 0.000000e+00 : f32
        %30 = vector.broadcast %cst_14 : f32 to vector<16x128xf32>
        %31 = arith.select %29, %19, %30 : vector<16x128xi1>, vector<16x128xf32>
        %32 = vector.shape_cast %31 : vector<16x128xf32> to vector<1x16x128xf32>
        %cst_15 = arith.constant dense<0.000000e+00> : vector<16x128xf32>
        %33 = vector.multi_reduction <add>, %32, %cst_15 [0] : vector<1x16x128xf32> to vector<16x128xf32>
        %34 = arith.addf %27, %33 : vector<16x128xf32>
        %c0_16 = arith.constant 0 : index
        %c0_17 = arith.constant 0 : index
        %35 = vector.load %arg4[%c0_16, %c0_17] : memref<16x128xf32, #tpu.memory_space<vmem>>, vector<16x128xf32>
        tpu.vector_store %arg4[%c0_16, %c0_17], %34 {strides = array<i32>} : memref<16x128xf32, #tpu.memory_space<vmem>>, vector<16x128xf32>,
      } else {
      }
    } else {
    }
    %c0_i32_4 = arith.constant 0 : i32
    %10 = arith.cmpi eq, %arg1, %c0_i32_4 : i32
    %11 = arith.extui %10 : i1 to i32
    %c0_i32_5 = arith.constant 0 : i32
    %12 = arith.cmpi ne, %11, %c0_i32_5 : i32
    scf.if %12 {
      %c0 = arith.constant 0 : index
      %c0_6 = arith.constant 0 : index
      %13 = vector.load %arg4[%c0, %c0_6] : memref<16x128xf32, #tpu.memory_space<vmem>>, vector<16x128xf32>
      %14 = vector.shape_cast %13 : vector<16x128xf32> to vector<1x16x128xf32>
      %cst = arith.constant dense<0.000000e+00> : vector<1xf32>
      %15 = vector.multi_reduction <add>, %14, %cst [1, 2] : vector<1x16x128xf32> to vector<1xf32>
      %16 = vector.shape_cast %15 : vector<1xf32> to vector<1x1x1xf32>
      %17 = vector.extract %16[0, 0, 0] : f32 from vector<1x1x1xf32>
      %c0_7 = arith.constant 0 : index
      %c0_8 = arith.constant 0 : index
      %18 = memref.load %arg3[%c0_7, %c0_8] : memref<1x1xf32, #tpu.memory_space<smem>>
      memref.store %17, %arg3[%c0_7, %c0_8] : memref<1x1xf32, #tpu.memory_space<smem>>
    } else {
    }
    return
  }
  func.func @transform_0(%arg0: i32, %arg1: i32) -> (i32, i32) {
    %c1_i32 = arith.constant 1 : i32
    %0 = arith.muli %arg0, %c1_i32 : i32
    %1 = arith.addi %0, %arg1 : i32
    %c0_i32 = arith.constant 0 : i32
    %2 = arith.minsi %1, %c0_i32 : i32
    %c0_i32_0 = arith.constant 0 : i32
    %c0_i32_1 = arith.constant 0 : i32
    return %2, %c0_i32_0 : i32, i32
  }
  func.func @transform_1(%arg0: i32, %arg1: i32) -> (i32, i32) {
    %c0_i32 = arith.constant 0 : i32
    %c0_i32_0 = arith.constant 0 : i32
    return %arg0, %c0_i32 : i32, i32
  }
}

</mosaic_0001>

<bundles_post_ra>
// kernel: tpu_custom_call.1
= control target key start
LH: loop header
LB: loop body
LE: loop exit
PB: predicated region body
PF: predicated region fallthrough
CT: control target
= control target key end

     0   :  { %6 = vsyncpa [#allocation4], 0  ;;  %s191_s0 = inlined_call_operand.hbm [shape: f32[16,128], index: 0, kind: input, shape index: {}]   ;;  %s192_s1 = inlined_call_operand.hbm [shape: f32[1,1], index: 1, kind: output, shape index: {}]  }
   0x1   :  { %7 = vsyncpa [#allocation5], 0  ;;  %s18_s8 = sshll.u32 %s191_s0, 4  ;;  %s171_s9 = smov [#allocation3]   ;;  %s19_s8 = int_to_ptr.hbm [resolvable:$true] %s18_s8 }
   0x2   :  { %s20_s10 = sshll.u32 %s171_s9, 4  ;;  %s172_s11 = smov 128   ;;  %s21_s10 = int_to_ptr.vmem [resolvable:$true] %s20_s10 }
   0x3   :  { %s173_s12 = smov 8  }
   0x4   :  { %26 = dma.hbm_to_vmem [thread:$0]  %s19_s8, 256, %s21_s10, [#allocation4], %s172_s11, %s172_s11, %s173_s12  }
   0x5   :  { %167 = dma.done.wait [#allocation4], 256  }
   0x6   :  { %168 = vsyncadd [#allocation4], 4294967040  ;;  %v48_v0 = vld [vmem:[#allocation3] sm:$0xff]  ;;  %v49_v1 = vld [vmem:[#allocation3 + $0x8] sm:$0xff]  ;;  %s112_s14 = sshll.u32 %s192_s1, 4  ;;  %s174_s16 = smov [#allocation6]   ;;  %s113_s14 = int_to_ptr.hbm [resolvable:$true] %s112_s14 }
   0x7   :  { %v50_v2 = vmax.f32 %v48_v0, 0.0  ;;  %v51_v3 = vmax.f32 %v49_v1, 0.0 }
   0x9   :  { %v52_v4 = vmin.f32 %v50_v2, 1.0  ;;  %v53_v5 = vmin.f32 %v51_v3, 1.0 }
   0xb   :  { %v54_v6 = vsub.f32 %v48_v0, %v52_v4  ;;  %v55_v7 = vsub.f32 %v49_v1, %v53_v5 }
   0xd   :  { %v56_v8 = vmul.f32 %v54_v6, %v54_v6  ;;  %v57_v9 = vmul.f32 %v55_v7, %v55_v7 }
   0xf   :  { %v95_v10 = vadd.f32 %v57_v9, %v56_v8 }
  0x11   :  { %96 = vadd.xlane.f32.xlu0 %v95_v10 }
  0x84   :  { %v97_v11 = vpop.xlane.xlu0 %96 }
  0x85   :  { %v98_v12 = vrot.slane %v97_v11, 4 }
  0x87   :  { %v99_v13 = vadd.f32 %v98_v12, %v97_v11 }
  0x89   :  { %v100_v14 = vrot.slane %v99_v13, 2 }
  0x8b   :  { %v101_v15 = vadd.f32 %v100_v14, %v99_v13 }
  0x8d   :  { %v102_v16 = vrot.slane %v101_v15, 1 }
  0x8f   :  { %v103_v17 = vadd.f32 %v102_v16, %v101_v15 }
  0x91   :  { %125 = vpush %v103_v17 }
  0xc2   :  { %s126_s15 = spop %125 }
  0xc3   :  { %106 = sst [smem:[#allocation6]] %s126_s15 }
  0xc4   :  { %115 = dma.smem_to_hbm %s174_s16, 16, %s113_s14, [#allocation5]  }
  0xc5   :  { %169 = dma.done.wait [#allocation5], 16  }
  0xc6   :  { %170 = vsyncadd [#allocation5], 4294967280 }
  0xc7   :  { %120 = sfence }
  0xc8   :  { %121 = vsyncpa [#allocation4], 1 }
  0xc9   :  { %122 = vsyncpa [#allocation5], 1 }

</bundles_post_ra>
